<compile_context>
chip_gen: v7x
topology: tpu7x:2x2x1
jax: 0.10.0
libtpu: 0.0.40
codegen_flags: <defaults>
</compile_context>

<pallas_src>
import math
import random

import jax
import jax.numpy as jnp
from jax.experimental import pallas as pl
from jax.experimental.pallas import tpu as pltpu


_LANES = 128        # vreg lane width -> lane-dense last dim
_MAX_TILE_ROWS = 2048  # 2048*128*4B = 1 MiB/tile; 6 live tiles ~= 6 MiB VMEM


# ---------------------------------------------------------------------------
# Pallas kernel: elementwise  (re, im) = (cos, sin)(phase + err)
#   err is a scalar fabrication error living in SMEM.
# ---------------------------------------------------------------------------
def _meta_complex_kernel(err_ref, phase_ref, re_ref, im_ref):
    phase = phase_ref[...] + err_ref[0]          # fabrication() additive error
    re_ref[...] = jnp.cos(phase)                 # Re(exp(i*phase))
    im_ref[...] = jnp.sin(phase)                 # Im(exp(i*phase))


def meta_complex_parts(meta_phase, fab_err):
    """(re, im) float32 arrays of exp(1j*(meta_phase + fab_err)), same shape."""
    shape = meta_phase.shape
    dtype = meta_phase.dtype
    n = math.prod(shape)

    # Lane-dense 2-D slab: (rows, 128), rows padded so the tile divides evenly.
    rows = pl.cdiv(n, _LANES)
    tile_rows = min(_MAX_TILE_ROWS, rows)
    rows_pad = pl.cdiv(rows, tile_rows) * tile_rows
    n_pad = rows_pad * _LANES

    flat = meta_phase.reshape(-1)
    if n_pad != n:
        flat = jnp.pad(flat, (0, n_pad - n))
    slab = flat.reshape(rows_pad, _LANES)

    err = jnp.reshape(jnp.asarray(fab_err, dtype=dtype), (1,))

    tile_spec = pl.BlockSpec((tile_rows, _LANES), lambda i: (i, 0))
    re, im = pl.pallas_call(
        _meta_complex_kernel,
        out_shape=(
            jax.ShapeDtypeStruct((rows_pad, _LANES), dtype),
            jax.ShapeDtypeStruct((rows_pad, _LANES), dtype),
        ),
        grid=(rows_pad // tile_rows,),
        in_specs=[
            pl.BlockSpec(memory_space=pltpu.MemorySpace.SMEM),   # scalar err
            tile_spec,                                           # phase tile
        ],
        out_specs=(tile_spec, tile_spec),
        compiler_params=pltpu.CompilerParams(
            dimension_semantics=("parallel",)),                  # 2 TCs on v7x
    )(err, slab)

    if n_pad != n:
        re = re.reshape(-1)[:n]
        im = im.reshape(-1)[:n]
    return re.reshape(shape), im.reshape(shape)


def meta_complex_pallas(meta_phase, fab_err):
    """exp(1j*(meta_phase + fab_err)) as complex64 (API-compatible wrapper)."""
    re, im = meta_complex_parts(meta_phase, fab_err)
    # TODO(synk): downstream consumers should take (re, im) directly; this
    # single lax.complex pass re-reads/re-writes the arrays once (API compat).
    return jax.lax.complex(re, im)


# ---------------------------------------------------------------------------
# JAX port of the ideal_meta module (glue / parameter init in plain JAX).
# ---------------------------------------------------------------------------
class IdealMeta:
    def __init__(self, slm_res, meta_init_range, key, **opt):
        self.opt = opt
        H, W = slm_res
        # init_meta: 2*pi*init_range*(-0.5 + U[0,1)) of shape (2, 1, H, W)
        u = jax.random.uniform(key, (2, 1, H, W), dtype=jnp.float32)
        self.meta_phase = 2.0 * math.pi * meta_init_range * (-0.5 + u)
        # jit the hot path once; fab_err is a traced argument (no recompiles).
        self._core = jax.jit(meta_complex_pallas)

    def forward(self, meta_err=False, max_err=False, key=None):
        # fabrication(): additive scalar error, kept on-device (traced scalar).
        # clip is a no-op in the original (size_limit=None).
        if meta_err:
            if max_err:
                fab = jnp.float32(self.opt['fab_err'])
            else:
                k = key if key is not None else jax.random.PRNGKey(1)
                fab = jnp.float32(self.opt['fab_err']) * jnp.abs(
                    jax.random.normal(k, (), dtype=jnp.float32))
        else:
            fab = jnp.float32(0.0)

        out = self._core(self.meta_phase, fab)     # Pallas hot path (jitted)
        return self._misalign(out, meta_err, max_err)

    def _misalign(self, m, meta_err, max_err):
        # Pure data movement (pad value 1.0 + crop), matches torch misalign().
        # TODO(synk): Python random.randint shifts are kept for parity with the
        # torch reference; a fully-traced version would use jax randint +
        # lax.dynamic_slice.
        if not meta_err:
            return m
        align_err = self.opt['align_err']
        if max_err:
            align_x, align_y = align_err, align_err
        else:
            align_x = random.randint(-align_err, align_err)
            align_y = random.randint(-align_err, align_err)
        pad_width = (
            (0, 0), (0, 0),
            (max(0, align_y), max(0, -align_y)),   # H (top, bottom)
            (max(0, align_x), max(0, -align_x)),   # W (left, right)
        )
        m = jnp.pad(m, pad_width, mode='constant', constant_values=1.0)
        m = m[..., 0:-align_y, :] if align_y > 0 else m[..., -align_y:, :]
        m = m[..., :, 0:-align_x] if align_x > 0 else m[..., :, -align_x:]
        return m


if __name__ == "__main__":
    key = jax.random.PRNGKey(0)
    opt = dict(fab_err=0.1, align_err=2, dev=None)

    # --- Small config consistent with the module: (P=2, C=1, H=16, W=16) ---
    m1 = IdealMeta((16, 16), 1.0, key, **opt)
    out1 = jax.block_until_ready(m1.forward(meta_err=False, max_err=False))
    ref1 = jnp.exp(1j * m1.meta_phase.astype(jnp.complex64))
    assert out1.shape == (2, 1, 16, 16)
    assert out1.dtype == jnp.complex64
    assert float(jnp.max(jnp.abs(out1 - ref1))) < 1e-5

    # --- Padding path: 2*1*10*10 = 200 elements (not a multiple of 128) ---
    m2 = IdealMeta((10, 10), 1.0, jax.random.PRNGKey(2), **opt)
    out2 = jax.block_until_ready(m2.forward())
    ref2 = jnp.exp(1j * m2.meta_phase.astype(jnp.complex64))
    assert out2.shape == (2, 1, 10, 10)
    assert float(jnp.max(jnp.abs(out2 - ref2))) < 1e-5

    # --- Max-error path: fabrication + misalign (deterministic) ---
    out3 = jax.block_until_ready(m1.forward(meta_err=True, max_err=True))
    a = opt['align_err']
    ref3 = jnp.exp(1j * (m1.meta_phase + opt['fab_err']).astype(jnp.complex64))
    ref3 = jnp.pad(ref3, ((0, 0), (0, 0), (a, 0), (a, 0)),
                   constant_values=1.0)[..., :-a, :-a]
    assert out3.shape == (2, 1, 16, 16)
    assert float(jnp.max(jnp.abs(out3 - ref3))) < 1e-5

    print("KERNEL_OK")
</pallas_src>

<mosaic_0001>
module attributes {stable_mosaic.version = 11 : i64} {
  func.func @_meta_complex_kernel(%arg0: i32, %arg1: memref<1xf32, #tpu.memory_space<smem>>, %arg2: memref<4x128xf32, #tpu.memory_space<vmem>>, %arg3: memref<4x128xf32, #tpu.memory_space<vmem>>, %arg4: memref<4x128xf32, #tpu.memory_space<vmem>>) attributes {dimension_semantics = [#tpu.dimension_semantics<parallel>], iteration_bounds = array<i64: 1>, scalar_prefetch = 0 : i64, scratch_operands = 0 : i64, tpu.core_type = #tpu.core_type<tc>, window_params = [{transform_indices = @transform_0, window_bounds = array<i64: 1>}, {transform_indices = @transform_1, window_bounds = array<i64: 4, 128>}, {transform_indices = @transform_2, window_bounds = array<i64: 4, 128>}, {transform_indices = @transform_3, window_bounds = array<i64: 4, 128>}]} {
    %c0 = arith.constant 0 : index
    %c0_0 = arith.constant 0 : index
    %0 = vector.load %arg2[%c0, %c0_0] : memref<4x128xf32, #tpu.memory_space<vmem>>, vector<4x128xf32>
    %c0_1 = arith.constant 0 : index
    %1 = memref.load %arg1[%c0_1] : memref<1xf32, #tpu.memory_space<smem>>
    %2 = vector.broadcast %1 : f32 to vector<4x128xf32>
    %3 = arith.addf %0, %2 : vector<4x128xf32>
    %4 = math.cos %3 : vector<4x128xf32>
    %c0_2 = arith.constant 0 : index
    %c0_3 = arith.constant 0 : index
    %5 = vector.load %arg3[%c0_2, %c0_3] : memref<4x128xf32, #tpu.memory_space<vmem>>, vector<4x128xf32>
    tpu.vector_store %arg3[%c0_2, %c0_3], %4 {strides = array<i32>} : memref<4x128xf32, #tpu.memory_space<vmem>>, vector<4x128xf32>,
    %6 = math.sin %3 : vector<4x128xf32>
    %c0_4 = arith.constant 0 : index
    %c0_5 = arith.constant 0 : index
    %7 = vector.load %arg4[%c0_4, %c0_5] : memref<4x128xf32, #tpu.memory_space<vmem>>, vector<4x128xf32>
    tpu.vector_store %arg4[%c0_4, %c0_5], %6 {strides = array<i32>} : memref<4x128xf32, #tpu.memory_space<vmem>>, vector<4x128xf32>,
    return
  }
  func.func @transform_0(%arg0: i32) -> i32 {
    %c0_i32 = arith.constant 0 : i32
    %c0_i32_0 = arith.constant 0 : i32
    return %c0_i32 : i32
  }
  func.func @transform_1(%arg0: i32) -> (i32, i32) {
    %c0_i32 = arith.constant 0 : i32
    %c0_i32_0 = arith.constant 0 : i32
    return %arg0, %c0_i32 : i32, i32
  }
  func.func @transform_2(%arg0: i32) -> (i32, i32) {
    %c0_i32 = arith.constant 0 : i32
    %c0_i32_0 = arith.constant 0 : i32
    return %arg0, %c0_i32 : i32, i32
  }
  func.func @transform_3(%arg0: i32) -> (i32, i32) {
    %c0_i32 = arith.constant 0 : i32
    %c0_i32_0 = arith.constant 0 : i32
    return %arg0, %c0_i32 : i32, i32
  }
}

</mosaic_0001>

<bundles_post_ra>
// kernel: custom-call
= control target key start
LH: loop header
LB: loop body
LE: loop exit
PB: predicated region body
PF: predicated region fallthrough
CT: control target
= control target key end

     0   :  { %s126_s0 = inlined_call_operand.vmem [shape: f32[2,1,16,16], index: 0, kind: input, shape index: {}]   ;;  %s127_s1 = inlined_call_operand.vmem [shape: f32[2,1,16,16], index: 1, kind: input, shape index: {}]   ;;  %s128_s2 = inlined_call_operand.hbm [shape: c64[2,1,16,16], index: 2, kind: output, shape index: {}]  }
   0x1   :  { %s87_s11 = scalar_lea.hbm %s128_s2, 512 }
   0x2   :  { %4 = vsyncpa [#allocation0], 0  ;;  %s5_s14 = sshll.u32 %s126_s0, 4  ;;  %s6_s14 = int_to_ptr.vmem [resolvable:$true] %s5_s14 }
   0x3   :  { %s18_s15 = scalar_lea.vmem %s6_s14, 512  ;;  %p23_p1 = scmp.lt.s32.totalorder %s6_s14, %s6_s14 }
   0x4   :  { %p19_p0 = scmp.ne.s32.totalorder %s6_s14, %s18_s15  ;;  %p24_p2 = scmp.lt.s32.totalorder %s18_s15, %s18_s15 }
   0x6   :  { %p25_p3 = por %p24_p2, %p23_p1 }
   0x8   :  { %p26_p4 = pnand %p25_p3, %p19_p0 }
   0xa   :  { %29 = shalt.err (!%p26_p4)  }
   0xb   :  { %p31_p5 = scmp.ne.s32.totalorder %s128_s2, %s87_s11  ;;  %s32_s0 = scalar_lea.hbm %s128_s2, 1024 }
   0xc   :  { %p33_p6 = scmp.lt.u32.totalorder %s32_s0, %s87_s11  ;;  %p34_p7 = scmp.lt.u32.totalorder %s87_s11, %s128_s2 }
   0xe   :  { %p35_p8 = por %p34_p7, %p33_p6 }
  0x10   :  { %p36_p9 = pnand %p35_p8, %p31_p5 }
  0x12   :  { %39 = shalt.err (!%p36_p9)  }
  0x13   :  { %8 = dma.vmem_to_hbm [thread:$0]  %s6_s14, 512, %s128_s2, [#allocation0] }
  0x14   :  { %65 = dma.done.wait [#allocation0], 512  }
  0x15   :  { %66 = vsyncadd [#allocation0], 4294966784 }
  0x16   :  { %10 = vsyncpa [#allocation0], 1 }
  0x17   :  { %11 = vsyncpa [#allocation1], 0  ;;  %s12_s28 = sshll.u32 %s127_s1, 4  ;;  %s13_s28 = int_to_ptr.vmem [resolvable:$true] %s12_s28 }
  0x18   :  { %s40_s29 = scalar_lea.vmem %s13_s28, 512  ;;  %p45_p11 = scmp.lt.s32.totalorder %s13_s28, %s13_s28 }
  0x19   :  { %p41_p10 = scmp.ne.s32.totalorder %s13_s28, %s40_s29  ;;  %p46_p12 = scmp.lt.s32.totalorder %s40_s29, %s40_s29 }
  0x1b   :  { %p47_p13 = por %p46_p12, %p45_p11 }
  0x1d   :  { %p48_p0 = pnand %p47_p13, %p41_p10 }
  0x1f   :  { %51 = shalt.err (!%p48_p0)  }
  0x20   :  { %p53_p1 = scmp.ne.s32.totalorder %s87_s11, %s32_s0  ;;  %p56_p2 = scmp.lt.u32.totalorder %s32_s0, %s32_s0 }
  0x22   :  { %p57_p3 = por %p56_p2, %p34_p7 }
  0x24   :  { %p59_p4 = por %p57_p3, %p33_p6 }
  0x26   :  { %p60_p5 = pnand %p59_p4, %p53_p1 }
  0x28   :  { %63 = shalt.err (!%p60_p5)  }
  0x29   :  { %15 = dma.vmem_to_hbm [thread:$0]  %s13_s28, 512, %s87_s11, [#allocation1] }
  0x2a   :  { %67 = dma.done.wait [#allocation1], 512  }
  0x2b   :  { %68 = vsyncadd [#allocation1], 4294966784 }
  0x2c   :  { %17 = vsyncpa [#allocation1], 1 }

// kernel: meta_complex_pallas.1
= control target key start
LH: loop header
LB: loop body
LE: loop exit
PB: predicated region body
PF: predicated region fallthrough
CT: control target
= control target key end

     0   :  { %v257_v14 = vmov 683565275   ;;  %v258_v16 = vmov 2475754826   ;;  %v259_v18 = vmov 2131351028   ;;  %s316_s0 = inlined_call_operand.<no memory space> [shape: f32[1], index: 0, kind: input, shape index: {}]   ;;  %s317_s1 = inlined_call_operand.vmem [shape: f32[4,128], index: 1, kind: input, shape index: {}]   ;;  %s318_s2 = inlined_call_operand.vmem [shape: f32[4,128], index: 2, kind: output, shape index: {0}]   ;;  %s319_s3 = inlined_call_operand.vmem [shape: f32[4,128], index: 3, kind: output, shape index: {1}]  }
   0x1   :  { %v14_v0 = vld [vmem:[%s317_s1] sm:$0xf]  ;;  %v16_v1 = vstv %s316_s0  ;;  %v260_v20 = vmov 2102212464   ;;  %v261_v22 = vmov 920167782  }
   0x2   :  { %v289_v2 = vadd.f32 %v16_v1, %v14_v0  ;;  %v262_v29 = vmov 1326507024  }
   0x4   :  { %v21_v3 = vand.u32 2139095040, %v289_v2  ;;  %v18_v5 = vand.u32 2147483647, %v289_v2  ;;  %vm20_vm7 = vcmp.lt.s32.totalorder %v289_v2, 0  ;;  %vm110_vm15 = vweird.f32 %v289_v2 }
   0x6   :  { %v22_v4 = vshrl.u32 %v21_v3, 23  ;;  %v25_v8 = vand.u32 8388607, %v18_v5  ;;  %vm19_vm8 = vcmp.le.f32.partialorder %v18_v5, 0.7853982 }
   0x8   :  { %v235_v6 = vadd.s32 4294967169, %v22_v4  ;;  %v26_v11 = vor.u32 8388608, %v25_v8 }
   0xa   :  { %v28_v7 = vadd.s32 1, %v235_v6  ;;  %v66_v31 = vshll.u32 %v26_v11, 8 }
   0xc   :  { %vm29_vm0 = vcmp.gt.s32.totalorder %v28_v7, 0 }
   0xd   :  { %v30_v9 = vsel %vm29_vm0, %v28_v7, 0 }
   0xe   :  { %v32_v10 = vand.u32 31, %v30_v9  ;;  %v31_v12 = vshrl.u32 %v30_v9, 5 }
  0x10   :  { %v33_v13 = vsub.s32 32, %v32_v10  ;;  %v35_v15 = vshll.u32 %v257_v14, %v32_v10  ;;  %v38_v17 = vshll.u32 %v258_v16, %v32_v10  ;;  %v41_v19 = vshll.u32 %v259_v18, %v32_v10 }
  0x11   :  { %v44_v21 = vshll.u32 %v260_v20, %v32_v10  ;;  %v47_v23 = vshll.u32 %v261_v22, %v32_v10  ;;  %vm50_vm1 = vcmp.lt.s32.totalorder %v31_v12, 1  ;;  %vm53_vm2 = vcmp.lt.s32.totalorder %v31_v12, 4 }
  0x12   :  { %v34_v24 = vshrl.u32 %v257_v14, %v33_v13  ;;  %v36_v25 = vshrl.u32 %v258_v16, %v33_v13  ;;  %v39_v26 = vshrl.u32 %v259_v18, %v33_v13  ;;  %v42_v27 = vshrl.u32 %v260_v20, %v33_v13 }
  0x13   :  { %v45_v28 = vshrl.u32 %v261_v22, %v33_v13  ;;  %v48_v30 = vshrl.u32 %v262_v29, %v33_v13  ;;  %vm51_vm3 = vcmp.lt.s32.totalorder %v31_v12, 2  ;;  %vm52_vm4 = vcmp.lt.s32.totalorder %v31_v12, 3 }
  0x14   :  { %v37_v32 = vor.u32 %v36_v25, %v35_v15  ;;  %v40_v33 = vor.u32 %v39_v26, %v38_v17  ;;  %v43_v34 = vor.u32 %v42_v27, %v41_v19 }
  0x15   :  { %v46_v35 = vor.u32 %v45_v28, %v44_v21  ;;  %v49_v36 = vor.u32 %v48_v30, %v47_v23 }
  0x16   :  { %v54_v37 = vsel %vm50_vm1, %v34_v24, %v37_v32  ;;  %v55_v38 = vsel %vm53_vm2, %v43_v34, 2102212464  ;;  %v58_v39 = vsel %vm50_vm1, %v37_v32, %v40_v33  ;;  %v62_v40 = vsel %vm50_vm1, %v40_v33, %v43_v34 }
  0x17   :  { %v56_v41 = vsel %vm52_vm4, %v40_v33, %v55_v38  ;;  %v59_v42 = vsel %vm53_vm2, %v46_v35, 920167782  ;;  %v63_v43 = vsel %vm53_vm2, %v49_v36, 1326507024 }
  0x18   :  { %v60_v44 = vsel %vm52_vm4, %v43_v34, %v59_v42  ;;  %v64_v45 = vsel %vm52_vm4, %v46_v35, %v63_v43  ;;  %v57_v46 = vsel %vm51_vm3, %v54_v37, %v56_v41 }
  0x19   :  { %v61_v47 = vsel %vm51_vm3, %v58_v39, %v60_v44  ;;  %v65_v48 = vsel %vm51_vm3, %v62_v40, %v64_v45  ;;  %v73_v53 = vmul.u32 %v66_v31, %v57_v46 }
  0x1a   :  { %v295_v49 = vmul.u32.u64.low %v66_v31, %v65_v48  ;;  %v296_v50 = vmul.u32.u64.high %v66_v31, %v65_v48, %v295_v49  ;;  %v298_v51 = vmul.u32.u64.low %v66_v31, %v61_v47  ;;  %v299_v52 = vmul.u32.u64.high %v66_v31, %v61_v47, %v298_v51 }
  0x1c   :  { %vm75_vm5 = vc.u32 %v296_v50, %v298_v51  ;;  %v76_v54 = vadd.s32 1, %v299_v52  ;;  %v74_v1 = vadd.s32 %v298_v51, %v296_v50 }
  0x1e   :  { %v77_v55 = vsel %vm75_vm5, %v76_v54, %v299_v52 }
  0x1f   :  { %v78_v56 = vadd.s32 %v77_v55, %v73_v53 }
  0x21   :  { %v79_v57 = vadd.s32 536870912, %v78_v56 }
  0x23   :  { %v80_v58 = vshrl.u32 %v79_v57, 30 }
  0x25   :  { %v81_v59 = vshll.u32 %v80_v58, 30  ;;  %v104_v15 = vsub.s32 4, %v80_v58 }
  0x27   :  { %v82_v60 = vsub.s32 %v78_v56, %v81_v59  ;;  %v105_v18 = vsel %vm20_vm7, %v104_v15, %v80_v58 }
  0x28   :  { %v107_v21 = vsel %vm19_vm8, 0, %v105_v18 }
  0x29   :  { %v84_v61 = vsub.s32 0, %v82_v60  ;;  %v215_v22 = vadd.s32 3, %v107_v21  ;;  %v111_v23 = vand.u32 3, %v107_v21 }
  0x2b   :  { %v236_v62 = vmin.u32 %v84_v61, %v82_v60  ;;  %v216_v24 = vand.u32 3, %v215_v22  ;;  %vm116_vm9 = vcmp.eq.s32.totalorder %v111_v23, 2  ;;  %vm113_vm11 = vcmp.eq.s32.totalorder %v111_v23, 0 }
  0x2c   :  { %vm112_vm13 = vcmp.lt.s32.totalorder %v111_v23, 2 }
  0x2d   :  { %v86_v63 = vclz %v236_v62  ;;  %vm221_vm10 = vcmp.eq.s32.totalorder %v216_v24, 2  ;;  %vm218_vm12 = vcmp.eq.s32.totalorder %v216_v24, 0  ;;  %vm217_vm14 = vcmp.lt.s32.totalorder %v216_v24, 2 }
  0x2f   :  { %v237_v0 = vadd.s32 4294967294, %v86_v63 }
  0x31   :  { %vm238_vm6 = vcmp.lt.s32.totalorder %v237_v0, 0 }
  0x32   :  { %v89_v3 = vsel %vm238_vm6, 0, %v237_v0 }
  0x33   :  { %v90_v4 = vsub.s32 32, %v89_v3  ;;  %v91_v6 = vshll.u32 %v82_v60, %v89_v3  ;;  %v94_v7 = vsub.s32 4294967266, %v89_v3 }
  0x35   :  { %v92_v8 = vshrl.u32 %v74_v1, %v90_v4  ;;  %v95_v9 = vadd.s32 127, %v94_v7 }
  0x37   :  { %v93_v10 = vor.u32 %v92_v8, %v91_v6  ;;  %v96_v11 = vshll.u32 %v95_v9, 23 }
  0x39   :  { %v97_v12 = vor.u32 4788187, %v96_v11  ;;  %v100_v13 = vcvt.s32.f32 %v93_v10 }
  0x3b   :  { %v98_v14 = vand.u32 2147483647, %v97_v12 }
  0x3d   :  { %v101_v16 = vmul.f32 %v100_v13, %v98_v14 }
  0x3f   :  { %v102_v17 = vxor.u32 2147483648, %v101_v16 }
  0x41   :  { %v103_v19 = vsel %vm20_vm7, %v102_v17, %v101_v16 }
  0x42   :  { %v106_v20 = vsel %vm19_vm8, %v289_v2, %v103_v19 }
  0x43   :  { %253 = vcosq.f32 %v106_v20 }
  0x44   :  { %255 = vsinq.f32 %v106_v20 }
  0x4d   :  { %v254_v25 = vpop.eup %253 }
  0x4e   :  { %v256_v26 = vpop.eup %255  ;;  %v117_v27 = vxor.u32 2147483648, %v254_v25 }
  0x4f   :  { %v114_v5 = vxor.u32 2147483648, %v256_v26 }
  0x50   :  { %v118_v28 = vsel %vm116_vm9, %v117_v27, %v256_v26  ;;  %v223_v29 = vsel %vm221_vm10, %v117_v27, %v256_v26 }
  0x51   :  { %v115_v30 = vsel %vm113_vm11, %v254_v25, %v114_v5  ;;  %v220_v31 = vsel %vm218_vm12, %v254_v25, %v114_v5 }
  0x52   :  { %v119_v32 = vsel %vm112_vm13, %v115_v30, %v118_v28  ;;  %v224_v33 = vsel %vm217_vm14, %v220_v31, %v223_v29 }
  0x53   :  { %v120_v34 = vsel %vm110_vm15, nan, %v119_v32  ;;  %v225_v35 = vsel %vm110_vm15, nan, %v224_v33 }
  0x54   :  { %121 = vst [vmem:[%s318_s2] sm:$0xf] %v120_v34  ;;  %226 = vst [vmem:[%s319_s3] sm:$0xf] %v225_v35 }

</bundles_post_ra>
